<compile_context>
chip_gen: v7x
topology: tpu7x:2x2x1
jax: 0.10.0
libtpu: 0.0.40
codegen_flags: <defaults>
</compile_context>

<pallas_src>
import functools

import jax
import jax.numpy as jnp
from jax.experimental import pallas as pl
from jax.experimental.pallas import tpu as pltpu

LANES = 128
GROUP_SUB = 16          # sublane rows per group (safe for f32 and bf16 tiling)
MAX_ROW_TILE = 1024     # rows (of 128 lanes) processed per grid step
NEUTRAL_LOGIT = -1.0e4  # pad value for y_pred: yields focal == 0 exactly


def _round_up(a, b):
    return ((a + b - 1) // b) * b


def _focal_loss_kernel(x_ref, y_ref, *rest, gamma, groups, gsize,
                       tiles_per_split, need_group_mask, has_weight):
    if has_weight:
        w_ref, o_ref = rest
    else:
        (o_ref,) = rest

    s = pl.program_id(0)   # TensorCore split (parallel)
    i = pl.program_id(1)   # row-tile within the split (reduction axis)

    # Output block stays VMEM-resident across the "arbitrary" axis -> accumulate
    # in place; zero it on the first step of each split.
    @pl.when(i == 0)
    def _():
        o_ref[...] = jnp.zeros_like(o_ref)

    x = x_ref[...].astype(jnp.float32)   # (gsize, 16, 128)
    y = y_ref[...].astype(jnp.float32)

    # Numerically stable BCE-with-logits (matches PyTorch):
    #   BCE = max(x, 0) - x*y + log1p(exp(-|x|))
    bce = jnp.maximum(x, 0.0) - x * y + jnp.log1p(jnp.exp(-jnp.abs(x)))
    t = 1.0 - jnp.exp(-bce)              # (1 - BCE_EXP), >= 0 since bce >= 0

    # (1 - BCE_EXP) ** gamma: unroll small integer gamma as repeated multiplies
    # (a general power lowers to exp(gamma*log(.)) -> 2 extra EUP transcendentals).
    if float(gamma).is_integer() and 0 <= int(gamma) <= 16:
        gi = int(gamma)
        if gi == 0:
            pw = None
        else:
            pw = t
            for _ in range(gi - 1):
                pw = pw * t
    else:
        pw = t ** gamma

    focal = bce if pw is None else pw * bce   # alpha folded into final scale
    if has_weight:
        focal = focal * w_ref[...].astype(jnp.float32)

    if need_group_mask:
        # Only emitted when the last block overhangs the array (partial-block
        # reads of unspecified data).  Ragged element tails inside valid groups
        # are already neutral (padded with NEUTRAL_LOGIT/0), so a single
        # group-granular iota compare suffices.
        gidx = s * tiles_per_split + i                    # global tile index
        grp = jax.lax.broadcasted_iota(jnp.int32, focal.shape, 0)
        focal = jnp.where(gidx * gsize + grp < groups, focal, 0.0)

    # Lane/sublane-parallel partial sums: elementwise VPU adds over the leading
    # (untiled) axis only; no cross-lane XLU reduce inside the hot loop.
    o_ref[...] += focal.sum(axis=0)


def focal_loss(y_pred, y_true, sample_weight=None, *, apply_sample_weight=False,
               alpha=0.25, gamma=2.0):
    """Pallas TPU focal loss (mean over all elements), matching FocalLoss.forward."""
    assert y_pred.shape == y_true.shape
    n_elems = y_pred.size

    # (flat array, neutral pad value) per stream; pads contribute exactly 0.
    streams = [(y_pred.reshape(-1), NEUTRAL_LOGIT),
               (y_true.reshape(-1), 0.0)]
    if apply_sample_weight:
        assert sample_weight is not None
        w = sample_weight
        if w.shape != y_pred.shape:
            # TODO(synk): a genuinely-broadcastable sample_weight (e.g. per-channel)
            # could get its own small BlockSpec instead of a full-size copy.
            w = jnp.broadcast_to(w, y_pred.shape)
        streams.append((w.reshape(-1), 0.0))

    # Lane-dense (groups, 16, 128) layout. Only ragged element counts need a
    # (small) neutral pad up to the next 16*128 boundary; aligned sizes are free.
    padded_rows = _round_up(pl.cdiv(n_elems, LANES), GROUP_SUB)
    padded_n = padded_rows * LANES
    if padded_n != n_elems:
        streams = [(jnp.pad(f, (0, padded_n - n_elems), constant_values=pv), pv)
                   for f, pv in streams]
    groups = padded_rows // GROUP_SUB
    args = [f.reshape(groups, GROUP_SUB, LANES) for f, _ in streams]

    row_tile = min(MAX_ROW_TILE, padded_rows)             # both multiples of 16
    gsize = row_tile // GROUP_SUB
    total_tiles = pl.cdiv(groups, gsize)

    # Two-way split across TensorCores when it divides evenly (up to ~2x on
    # v7x's 2 TCs; a no-op serial outer loop on single-TC v5e/v6e).
    num_splits = 2 if (total_tiles >= 2 and total_tiles % 2 == 0) else 1
    tiles_per_split = total_tiles // num_splits
    # Mask only needed when the grid overhangs the group axis (partial blocks).
    need_group_mask = (total_tiles * gsize) != groups

    kernel = functools.partial(
        _focal_loss_kernel, gamma=float(gamma), groups=groups, gsize=gsize,
        tiles_per_split=tiles_per_split, need_group_mask=need_group_mask,
        has_weight=apply_sample_weight)

    in_spec = pl.BlockSpec((gsize, GROUP_SUB, LANES),
                           lambda s, i: (s * tiles_per_split + i, 0, 0))

    partials = pl.pallas_call(
        kernel,
        out_shape=jax.ShapeDtypeStruct((num_splits * GROUP_SUB, LANES), jnp.float32),
        grid_spec=pltpu.PrefetchScalarGridSpec(
            num_scalar_prefetch=0,
            grid=(num_splits, tiles_per_split),
            in_specs=[in_spec] * len(args),
            out_specs=pl.BlockSpec((GROUP_SUB, LANES), lambda s, i: (s, 0)),
        ),
        compiler_params=pltpu.CompilerParams(
            dimension_semantics=("parallel", "arbitrary")),
    )(*args)

    # Tiny final reduction (<= 2*16*128 floats) in plain JAX; alpha and 1/N are
    # folded into one scalar multiply.
    return jnp.sum(partials) * (float(alpha) / n_elems)


def _focal_loss_ref(y_pred, y_true, sample_weight=None, *, apply_sample_weight=False,
                    alpha=0.25, gamma=2.0):
    x = y_pred.astype(jnp.float32)
    y = y_true.astype(jnp.float32)
    bce = jnp.maximum(x, 0.0) - x * y + jnp.log1p(jnp.exp(-jnp.abs(x)))
    fl = alpha * (1.0 - jnp.exp(-bce)) ** gamma * bce
    if apply_sample_weight:
        fl = fl * sample_weight.astype(jnp.float32)
    return jnp.mean(fl)


if __name__ == "__main__":
    key = jax.random.PRNGKey(0)
    k1, k2, k3 = jax.random.split(key, 3)

    # Shapes implied by NCHW segmentation-style usage: (B, C, H, W)
    B, C, H, W = 2, 4, 16, 16
    y_pred = jax.random.normal(k1, (B, C, H, W), jnp.float32) * 2.0
    y_true = (jax.random.uniform(k2, (B, C, H, W)) > 0.5).astype(jnp.float32)
    sample_weight = jax.random.uniform(k3, (B, C, H, W), jnp.float32) + 0.5

    # Default config: apply_sample_weight=False, alpha=0.25, gamma=2
    out = jax.block_until_ready(focal_loss(y_pred, y_true))
    ref = _focal_loss_ref(y_pred, y_true)
    assert jnp.allclose(out, ref, rtol=1e-4, atol=1e-6), (out, ref)

    # Sample-weight branch.
    out_w = jax.block_until_ready(
        focal_loss(y_pred, y_true, sample_weight, apply_sample_weight=True))
    ref_w = _focal_loss_ref(y_pred, y_true, sample_weight, apply_sample_weight=True)
    assert jnp.allclose(out_w, ref_w, rtol=1e-4, atol=1e-6), (out_w, ref_w)

    # Ragged element count -> exercises the neutral-value tail pad.
    kp, kt = jax.random.split(k1)
    yp_r = jax.random.normal(kp, (3, 5, 7, 11), jnp.float32)
    yt_r = (jax.random.uniform(kt, (3, 5, 7, 11)) > 0.5).astype(jnp.float32)
    out_r = jax.block_until_ready(focal_loss(yp_r, yt_r))
    ref_r = _focal_loss_ref(yp_r, yt_r)
    assert jnp.allclose(out_r, ref_r, rtol=1e-4, atol=1e-6), (out_r, ref_r)

    # Multi-tile + two-way split path, bf16 inputs (native-dtype streaming).
    kp2, kt2 = jax.random.split(k2)
    yp_b = (jax.random.normal(kp2, (2, 8, 128, 128), jnp.float32) * 2.0).astype(jnp.bfloat16)
    yt_b = (jax.random.uniform(kt2, (2, 8, 128, 128)) > 0.5).astype(jnp.bfloat16)
    out_b = jax.block_until_ready(focal_loss(yp_b, yt_b))
    ref_b = _focal_loss_ref(yp_b, yt_b)
    assert jnp.allclose(out_b, ref_b, rtol=1e-4, atol=1e-5), (out_b, ref_b)

    # Multi-tile + split + grid overhang -> exercises the group-granular mask.
    kp3, kt3 = jax.random.split(k3)
    yp_m = jax.random.normal(kp3, (3, 8, 128, 160), jnp.float32)
    yt_m = (jax.random.uniform(kt3, (3, 8, 128, 160)) > 0.5).astype(jnp.float32)
    out_m = jax.block_until_ready(focal_loss(yp_m, yt_m))
    ref_m = _focal_loss_ref(yp_m, yt_m)
    assert jnp.allclose(out_m, ref_m, rtol=1e-4, atol=1e-6), (out_m, ref_m)

    print("KERNEL_OK")
</pallas_src>

<mosaic_0001>
module attributes {stable_mosaic.version = 11 : i64} {
  func.func @_focal_loss_kernel(%arg0: i32, %arg1: i32, %arg2: memref<1x16x128xf32, #tpu.memory_space<vmem>>, %arg3: memref<1x16x128xf32, #tpu.memory_space<vmem>>, %arg4: memref<16x128xf32, #tpu.memory_space<vmem>>) attributes {dimension_semantics = [#tpu.dimension_semantics<parallel>, #tpu.dimension_semantics<arbitrary>], iteration_bounds = array<i64: 1, 1>, scalar_prefetch = 0 : i64, scratch_operands = 0 : i64, tpu.core_type = #tpu.core_type<tc>, window_params = [{transform_indices = @transform_0, window_bounds = array<i64: 1, 16, 128>}, {transform_indices = @transform_1, window_bounds = array<i64: 1, 16, 128>}, {transform_indices = @transform_2, window_bounds = array<i64: 16, 128>}]} {
    %c0_i32 = arith.constant 0 : i32
    %0 = arith.cmpi eq, %arg1, %c0_i32 : i32
    %1 = arith.extui %0 : i1 to i32
    %c0_i32_0 = arith.constant 0 : i32
    %2 = arith.cmpi ne, %1, %c0_i32_0 : i32
    scf.if %2 {
      %cst_14 = arith.constant 0.000000e+00 : f32
      %26 = vector.broadcast %cst_14 : f32 to vector<16x128xf32>
      %c0_15 = arith.constant 0 : index
      %c0_16 = arith.constant 0 : index
      %27 = vector.load %arg4[%c0_15, %c0_16] : memref<16x128xf32, #tpu.memory_space<vmem>>, vector<16x128xf32>
      tpu.vector_store %arg4[%c0_15, %c0_16], %26 {strides = array<i32>} : memref<16x128xf32, #tpu.memory_space<vmem>>, vector<16x128xf32>,
    } else {
    }
    %c0 = arith.constant 0 : index
    %c0_1 = arith.constant 0 : index
    %c0_2 = arith.constant 0 : index
    %3 = vector.load %arg2[%c0, %c0_1, %c0_2] : memref<1x16x128xf32, #tpu.memory_space<vmem>>, vector<1x16x128xf32>
    %c0_3 = arith.constant 0 : index
    %c0_4 = arith.constant 0 : index
    %c0_5 = arith.constant 0 : index
    %4 = vector.load %arg3[%c0_3, %c0_4, %c0_5] : memref<1x16x128xf32, #tpu.memory_space<vmem>>, vector<1x16x128xf32>
    %cst = arith.constant 0.000000e+00 : f32
    %5 = vector.broadcast %cst : f32 to vector<1x16x128xf32>
    %6 = arith.maximumf %3, %5 : vector<1x16x128xf32>
    %7 = arith.mulf %3, %4 : vector<1x16x128xf32>
    %8 = arith.subf %6, %7 : vector<1x16x128xf32>
    %9 = math.absf %3 : vector<1x16x128xf32>
    %cst_6 = arith.constant 0.000000e+00 : f32
    %10 = vector.broadcast %cst_6 : f32 to vector<1x16x128xf32>
    %11 = arith.subf %10, %9 : vector<1x16x128xf32>
    %12 = math.exp %11 : vector<1x16x128xf32>
    %13 = math.log1p %12 : vector<1x16x128xf32>
    %14 = arith.addf %8, %13 : vector<1x16x128xf32>
    %cst_7 = arith.constant 0.000000e+00 : f32
    %15 = vector.broadcast %cst_7 : f32 to vector<1x16x128xf32>
    %16 = arith.subf %15, %14 : vector<1x16x128xf32>
    %17 = math.exp %16 : vector<1x16x128xf32>
    %cst_8 = arith.constant 1.000000e+00 : f32
    %18 = vector.broadcast %cst_8 : f32 to vector<1x16x128xf32>
    %19 = arith.subf %18, %17 : vector<1x16x128xf32>
    %20 = arith.mulf %19, %19 : vector<1x16x128xf32>
    %21 = arith.mulf %20, %14 : vector<1x16x128xf32>
    %c0_9 = arith.constant 0 : index
    %c0_10 = arith.constant 0 : index
    %22 = vector.load %arg4[%c0_9, %c0_10] : memref<16x128xf32, #tpu.memory_space<vmem>>, vector<16x128xf32>
    %cst_11 = arith.constant dense<0.000000e+00> : vector<16x128xf32>
    %23 = vector.multi_reduction <add>, %21, %cst_11 [0] : vector<1x16x128xf32> to vector<16x128xf32>
    %24 = arith.addf %22, %23 : vector<16x128xf32>
    %c0_12 = arith.constant 0 : index
    %c0_13 = arith.constant 0 : index
    %25 = vector.load %arg4[%c0_12, %c0_13] : memref<16x128xf32, #tpu.memory_space<vmem>>, vector<16x128xf32>
    tpu.vector_store %arg4[%c0_12, %c0_13], %24 {strides = array<i32>} : memref<16x128xf32, #tpu.memory_space<vmem>>, vector<16x128xf32>,
    return
  }
  func.func @transform_0(%arg0: i32, %arg1: i32) -> (i32, i32, i32) {
    %c1_i32 = arith.constant 1 : i32
    %0 = arith.muli %arg0, %c1_i32 : i32
    %1 = arith.addi %0, %arg1 : i32
    %c0_i32 = arith.constant 0 : i32
    %c0_i32_0 = arith.constant 0 : i32
    %c0_i32_1 = arith.constant 0 : i32
    return %1, %c0_i32, %c0_i32_0 : i32, i32, i32
  }
  func.func @transform_1(%arg0: i32, %arg1: i32) -> (i32, i32, i32) {
    %c1_i32 = arith.constant 1 : i32
    %0 = arith.muli %arg0, %c1_i32 : i32
    %1 = arith.addi %0, %arg1 : i32
    %c0_i32 = arith.constant 0 : i32
    %c0_i32_0 = arith.constant 0 : i32
    %c0_i32_1 = arith.constant 0 : i32
    return %1, %c0_i32, %c0_i32_0 : i32, i32, i32
  }
  func.func @transform_2(%arg0: i32, %arg1: i32) -> (i32, i32) {
    %c0_i32 = arith.constant 0 : i32
    %c0_i32_0 = arith.constant 0 : i32
    return %arg0, %c0_i32 : i32, i32
  }
}

</mosaic_0001>

<bundles_post_ra>
// kernel: tpu_custom_call.1
= control target key start
LH: loop header
LB: loop body
LE: loop exit
PB: predicated region body
PF: predicated region fallthrough
CT: control target
= control target key end

     0   :  { %7 = vsyncpa [#allocation3], 0  ;;  %s287_s0 = inlined_call_operand.hbm [shape: f32[1,16,128], index: 0, kind: input, shape index: {}]   ;;  %s288_s1 = inlined_call_operand.hbm [shape: f32[1,16,128], index: 1, kind: input, shape index: {}]   ;;  %s289_s2 = inlined_call_operand.hbm [shape: f32[16,128], index: 2, kind: output, shape index: {}]  }
   0x1   :  { %8 = vsyncpa [#allocation6], 0 }
   0x2   :  { %9 = vsyncpa [#allocation4], 0  ;;  %s222_s9 = smov [#allocation2]   ;;  %s150_s13 = scalar_lea.hbm %s287_s0, 256 }
   0x3   :  { %s19_s10 = sshll.u32 %s222_s9, 4  ;;  %p151_p0 = scmp.ne.s32.totalorder %s287_s0, %s150_s13  ;;  %s20_s10 = int_to_ptr.vmem [resolvable:$true] %s19_s10 }
   0x4   :  { %p154_p1 = scmp.lt.u32.totalorder %s150_s13, %s287_s0 }
   0x6   :  { %p156_p2 = pnand %p154_p1, %p151_p0 }
   0x8   :  { %159 = shalt.err (!%p156_p2)
}
   0x9   :  { %s160_s18 = scalar_lea.vmem %s20_s10, 256  ;;  %p165_p4 = scmp.lt.s32.totalorder %s20_s10, %s20_s10 }
   0xa   :  { %p161_p3 = scmp.ne.s32.totalorder %s20_s10, %s160_s18  ;;  %p166_p5 = scmp.lt.s32.totalorder %s160_s18, %s160_s18 }
   0xc   :  { %p167_p6 = por %p166_p5, %p165_p4 }
   0xe   :  { %p168_p7 = pnand %p167_p6, %p161_p3 }
  0x10   :  { %171 = shalt.err (!%p168_p7)
}
  0x11   :  { %s223_s19 = smov 128   ;;  %s224_s20 = smov 8  }
  0x12   :  { %25 = dma.hbm_to_vmem [thread:$0]  %s287_s0, 256, %s20_s10, [#allocation3], %s223_s19, %s223_s19, %s224_s20  }
  0x13   :  { %s225_s23 = smov [#allocation5]   ;;  %s172_s27 = scalar_lea.hbm %s288_s1, 256 }
  0x14   :  { %s35_s24 = sshll.u32 %s225_s23, 4  ;;  %p173_p8 = scmp.ne.s32.totalorder %s288_s1, %s172_s27  ;;  %s36_s24 = int_to_ptr.vmem [resolvable:$true] %s35_s24 }
  0x15   :  { %p176_p9 = scmp.lt.u32.totalorder %s172_s27, %s288_s1 }
  0x17   :  { %p178_p10 = pnand %p176_p9, %p173_p8 }
  0x19   :  { %181 = shalt.err (!%p178_p10)
}
  0x1a   :  { %s182_s4 = scalar_lea.vmem %s36_s24, 256  ;;  %p187_p12 = scmp.lt.s32.totalorder %s36_s24, %s36_s24 }
  0x1b   :  { %p183_p11 = scmp.ne.s32.totalorder %s36_s24, %s182_s4  ;;  %p188_p13 = scmp.lt.s32.totalorder %s182_s4, %s182_s4 }
  0x1d   :  { %p189_p0 = por %p188_p13, %p187_p12 }
  0x1f   :  { %p190_p1 = pnand %p189_p0, %p183_p11 }
  0x21   :  { %193 = shalt.err (!%p190_p1)
}
  0x22   :  { %41 = dma.hbm_to_vmem [thread:$0]  %s288_s1, 256, %s36_s24, [#allocation6], %s223_s19, %s223_s19, %s224_s20  }
  0x23   :  { %216 = dma.done.wait [#allocation3], 256  }
  0x24   :  { %217 = vsyncadd [#allocation3], 4294967040 }
  0x25   :  { %218 = dma.done.wait [#allocation6], 256  }
  0x26   :  { %219 = vsyncadd [#allocation6], 4294967040  ;;  %v56_v0 = vld [vmem:[#allocation2] sm:$0xff]  ;;  %v57_v1 = vld [vmem:[#allocation2 + $0x8] sm:$0xff]  ;;  %s226_s1 = smov [#allocation7]  }
  0x27   :  { %v66_v2 = vand.u32 2147483647, %v56_v0  ;;  %v67_v3 = vand.u32 2147483647, %v57_v1  ;;  %v58_v14 = vld [vmem:[#allocation5] sm:$0xff]  ;;  %v59_v15 = vld [vmem:[#allocation5 + $0x8] sm:$0xff] }
  0x28   :  { %v60_v17 = vmax.f32 %v56_v0, 0.0  ;;  %v62_v18 = vmul.f32 %v58_v14, %v56_v0  ;;  %v61_v21 = vmax.f32 %v57_v1, 0.0  ;;  %v63_v22 = vmul.f32 %v59_v15, %v57_v1  ;;  %s119_s6 = sshll.u32 %s226_s1, 4  ;;  %s120_s6 = int_to_ptr.vmem [resolvable:$true] %s119_s6 }
  0x29   :  { %v68_v4 = vsub.f32 0.0, %v66_v2  ;;  %v69_v5 = vsub.f32 0.0, %v67_v3  ;;  %s194_s7 = scalar_lea.vmem %s120_s6, 256  ;;  %p199_p3 = scmp.lt.s32.totalorder %s120_s6, %s120_s6 }
  0x2a   :  { %v64_v26 = vsub.f32 %v60_v17, %v62_v18  ;;  %v65_v30 = vsub.f32 %v61_v21, %v63_v22  ;;  %p195_p2 = scmp.ne.s32.totalorder %s120_s6, %s194_s7  ;;  %p200_p4 = scmp.lt.s32.totalorder %s194_s7, %s194_s7 }
  0x2b   :  { %v70_v6 = vmul.f32 1.442695, %v68_v4  ;;  %v72_v7 = vmul.f32 1.442695, %v69_v5 }
  0x2c   :  { %p201_p5 = por %p200_p4, %p199_p3 }
  0x2d   :  { %138 = vpow2.f32 %v70_v6 }
  0x2e   :  { %140 = vpow2.f32 %v72_v7  ;;  %p202_p6 = pnand %p201_p5, %p195_p2 }
  0x37   :  { %v139_v8 = vpop.eup %138 }
  0x38   :  { %v141_v9 = vpop.eup %140  ;;  %v74_v10 = vadd.f32 1.0, %v139_v8  ;;  %v77_v12 = vmul.f32 -0.5, %v139_v8  ;;  %v80_v19 = vand.u32 2147483647, %v139_v8 }
  0x39   :  { %v83_v11 = vadd.f32 1.0, %v141_v9  ;;  %v86_v13 = vmul.f32 -0.5, %v141_v9  ;;  %v89_v23 = vand.u32 2147483647, %v141_v9 }
  0x3a   :  { %142 = vlog2.f32 %v74_v10  ;;  %v78_v16 = vadd.f32 1.0, %v77_v12  ;;  %vm81_vm0 = vcmp.lt.f32.partialorder %v80_v19, 0.0004427343 }
  0x3b   :  { %144 = vlog2.f32 %v83_v11  ;;  %v87_v20 = vadd.f32 1.0, %v86_v13  ;;  %vm90_vm1 = vcmp.lt.f32.partialorder %v89_v23, 0.0004427343 }
  0x3c   :  { %v79_v24 = vmul.f32 %v139_v8, %v78_v16 }
  0x3d   :  { %v88_v27 = vmul.f32 %v141_v9, %v87_v20 }
  0x44   :  { %v143_v25 = vpop.eup %142 }
  0x45   :  { %v145_v28 = vpop.eup %144  ;;  %v76_v29 = vmul.f32 0.6931472, %v143_v25 }
  0x46   :  { %v85_v31 = vmul.f32 0.6931472, %v145_v28 }
  0x47   :  { %v82_v32 = vsel %vm81_vm0, %v79_v24, %v76_v29 }
  0x48   :  { %v92_v33 = vadd.f32 %v82_v32, %v64_v26  ;;  %v91_v34 = vsel %vm90_vm1, %v88_v27, %v85_v31 }
  0x49   :  { %v93_v35 = vadd.f32 %v91_v34, %v65_v30 }
  0x4a   :  { %v94_v36 = vsub.f32 0.0, %v92_v33 }
  0x4b   :  { %v95_v37 = vsub.f32 0.0, %v93_v35 }
  0x4c   :  { %v96_v38 = vmul.f32 1.442695, %v94_v36 }
  0x4d   :  { %v98_v39 = vmul.f32 1.442695, %v95_v37 }
  0x4e   :  { %146 = vpow2.f32 %v96_v38 }
  0x4f   :  { %148 = vpow2.f32 %v98_v39 }
  0x58   :  { %v147_v40 = vpop.eup %146 }
  0x59   :  { %v149_v41 = vpop.eup %148  ;;  %v100_v42 = vsub.f32 1.0, %v147_v40 }
  0x5a   :  { %v101_v43 = vsub.f32 1.0, %v149_v41 }
  0x5b   :  { %v102_v44 = vmul.f32 %v100_v42, %v100_v42 }
  0x5c   :  { %v103_v45 = vmul.f32 %v101_v43, %v101_v43 }
  0x5d   :  { %v104_v46 = vmul.f32 %v102_v44, %v92_v33 }
  0x5e   :  { %v105_v47 = vmul.f32 %v103_v45, %v93_v35 }
  0x5f   :  { %112 = vst [vmem:[#allocation7] sm:$0xff] %v104_v46 }
  0x60   :  { %113 = vst [vmem:[#allocation7 + $0x8] sm:$0xff] %v105_v47 }
  0x61   :  { %205 = shalt.err (!%p202_p6)
}
  0x62   :  { %s206_s10 = scalar_lea.hbm %s289_s2, 256 }
  0x63   :  { %p207_p7 = scmp.ne.s32.totalorder %s289_s2, %s206_s10  ;;  %p210_p8 = scmp.lt.u32.totalorder %s206_s10, %s289_s2 }
  0x65   :  { %p212_p9 = pnand %p210_p8, %p207_p7 }
  0x67   :  { %215 = shalt.err (!%p212_p9)
}
  0x68   :  { %125 = dma.vmem_to_hbm [thread:$0]  %s120_s6, 256, %s289_s2, [#allocation4], %s223_s19, %s223_s19, %s224_s20  }
  0x69   :  { %220 = dma.done.wait [#allocation4], 256  }
  0x6a   :  { %221 = vsyncadd [#allocation4], 4294967040 }
  0x6b   :  { %129 = vsyncpa [#allocation3], 1 }
  0x6c   :  { %130 = vsyncpa [#allocation6], 1 }
  0x6d   :  { %131 = vsyncpa [#allocation4], 1 }

</bundles_post_ra>
